<compile_context>
chip_gen: v6e
topology: v6e:2x2x1
jax: 0.10.0
libtpu: 0.0.40
codegen_flags: <defaults>
</compile_context>

<pallas_src>
import functools
import math

import jax
import jax.numpy as jnp
from jax import lax
from jax.experimental import pallas as pl
from jax.experimental.pallas import tpu as pltpu

_HALF_LOG_2PI = 0.5 * math.log(2.0 * math.pi)


def _round_up(n, m):
    return ((n + m - 1) // m) * m


def _softplus(v):
    # numerically-stable softplus (VPU/EUP ops only)
    return jnp.logaddexp(v, 0.0)


def vi_model_kernel(x_ref, w_ref, b_ref, y_ref, logp_ref, *, input_dim, output_dim):
    # stacked params: index 0 = mean, 1 = rho, 2 = eps
    in_p, out_p = w_ref.shape[1], w_ref.shape[2]

    wrho, eps_w = w_ref[1], w_ref[2]
    brho, eps_b = b_ref[1], b_ref[2]

    s_w = _softplus(wrho)
    s_b = _softplus(brho)

    # --- log q(z | mu, rho), simplified with (z - mu) == s * eps ---------------
    # Computed before the sampled weight is built to keep the live vreg set small.
    lp_w = -_HALF_LOG_2PI - jnp.log(s_w) - 0.5 * eps_w * eps_w
    lp_b = -_HALF_LOG_2PI - jnp.log(s_b) - 0.5 * eps_b * eps_b

    # Mask out padded elements; emit only the masks that are actually needed
    # (static, trace-time decision — with input_dim a multiple of 8 only the
    # column mask survives, and with no padding at all neither does).
    w_mask = None
    if out_p > output_dim:
        col_valid = lax.broadcasted_iota(jnp.int32, (1, out_p), 1) < output_dim
        lp_b = jnp.where(col_valid, lp_b, 0.0)
        w_mask = col_valid
    if in_p > input_dim:
        row_valid = lax.broadcasted_iota(jnp.int32, (in_p, 1), 0) < input_dim
        w_mask = row_valid if w_mask is None else (w_mask & row_valid)
    if w_mask is not None:
        lp_w = jnp.where(w_mask, lp_w, 0.0)

    # staged reduction (lane reduce, then final scalar); scalar goes out via SMEM
    lp_w_rows = jnp.sum(lp_w, axis=1, keepdims=True)
    logp_ref[0, 0] = jnp.sum(lp_w_rows) + jnp.sum(lp_b)

    # --- reparameterized sample + linear layer (MXU) + sigmoid (VPU/EUP) -------
    weight = w_ref[0] + s_w * eps_w
    bias = b_ref[0] + s_b * eps_b
    z = jnp.dot(x_ref[...], weight, preferred_element_type=jnp.float32) + bias
    y_ref[...] = jax.nn.sigmoid(z)


def vi_model_forward(x, weight_mean, weight_rho, bias_mean, bias_rho, eps_w, eps_b):
    """Flattens x to (-1, input_dim) like x.view(-1, input_dim) and runs one
    single-tile, gridless kernel.

    Padding policy: only the sublane dims are rounded to 8 and the output lane
    dim to 128. Padded weight/bias entries are zero-mean / zero-eps, so they
    add exact zeros to the matmul; padded log-prob terms are masked in-kernel.
    """
    input_dim, output_dim = weight_mean.shape
    x2 = x.reshape(-1, input_dim).astype(jnp.float32)
    B = x2.shape[0]

    in_p = _round_up(input_dim, 8)      # contraction dim: sublane multiple only
    out_p = _round_up(output_dim, 128)  # lane dim of weight / bias / y: lane-dense
    b_p = _round_up(B, 8)               # sublane dim of x / y

    x_pad = jnp.pad(x2, ((0, b_p - B), (0, in_p - input_dim)))

    # stack [mean, rho, eps] so the kernel takes 3 inputs (3 DMAs) instead of 7.
    # jnp.stack + jnp.pad fuse into a couple of XLA ops (vs zeros + 3x scatter).
    w_stack = jnp.pad(
        jnp.stack([weight_mean, weight_rho, eps_w]).astype(jnp.float32),
        ((0, 0), (0, in_p - input_dim), (0, out_p - output_dim)),
    )
    b_stack = jnp.pad(
        jnp.stack(
            [bias_mean.reshape(-1), bias_rho.reshape(-1), eps_b.reshape(-1)]
        ).astype(jnp.float32)[:, None, :],
        ((0, 0), (0, 0), (0, out_p - output_dim)),
    )

    kernel = functools.partial(
        vi_model_kernel, input_dim=input_dim, output_dim=output_dim
    )

    # NOTE: single-tile / gridless on purpose — per-grid-step overhead (~0.35us)
    # dwarfs this kernel's compute. If B ever grows to ~1-2K rows, add a
    # ("parallel",) grid over batch (tile M to 128 on v5e / 256 on v6e,v7x),
    # guard the logp SMEM write with pl.when(pl.program_id(0) == 0), and cast
    # x/weight to bf16 for the dot (keep preferred_element_type=f32).
    y_pad, logp = pl.pallas_call(
        kernel,
        out_shape=(
            jax.ShapeDtypeStruct((b_p, out_p), jnp.float32),
            jax.ShapeDtypeStruct((1, 1), jnp.float32),
        ),
        in_specs=[pl.BlockSpec(memory_space=pltpu.MemorySpace.VMEM)] * 3,
        out_specs=(
            pl.BlockSpec(memory_space=pltpu.MemorySpace.VMEM),
            pl.BlockSpec(memory_space=pltpu.MemorySpace.SMEM),
        ),
    )(x_pad, w_stack, b_stack)

    return y_pad[:B, :output_dim], logp[0, 0]


def _reference(x, wm, wrho, bm, brho, eps_w, eps_b):
    x2 = x.reshape(-1, wm.shape[0])
    s_w = jax.nn.softplus(wrho)
    s_b = jax.nn.softplus(brho)
    weight = wm + s_w * eps_w
    bias = bm + s_b * eps_b
    c = 0.5 * jnp.log(2.0 * jnp.pi)
    lp_w = -c - jnp.log(s_w) - (weight - wm) ** 2 / (2.0 * s_w ** 2)
    lp_b = -c - jnp.log(s_b) - (bias - bm) ** 2 / (2.0 * s_b ** 2)
    y = jax.nn.sigmoid(x2 @ weight + bias)
    return y, jnp.sum(lp_w) + jnp.sum(lp_b)


if __name__ == "__main__":
    key = jax.random.PRNGKey(0)
    k_x, k_w, k_b = jax.random.split(key, 3)

    # small shapes consistent with the module: x is (2, 4, 32) -> view(-1, 32)
    input_dim, output_dim = 32, 16
    x = jax.random.normal(k_x, (2, 4, input_dim), dtype=jnp.float32)

    # deterministic parameter init exactly as in vi_layer.__init__
    weight_mean = jnp.zeros((input_dim, output_dim), jnp.float32)
    weight_rho = jnp.zeros((input_dim, output_dim), jnp.float32)
    bias_mean = jnp.ones((output_dim,), jnp.float32)
    bias_rho = jnp.ones((output_dim,), jnp.float32)

    # reparameterization noise (torch.randn_like analogue), deterministic
    eps_w = jax.random.normal(k_w, (input_dim, output_dim), dtype=jnp.float32)
    eps_b = jax.random.normal(k_b, (output_dim,), dtype=jnp.float32)

    y, logp = vi_model_forward(
        x, weight_mean, weight_rho, bias_mean, bias_rho, eps_w, eps_b
    )
    jax.block_until_ready((y, logp))

    y_ref, logp_ref = _reference(
        x, weight_mean, weight_rho, bias_mean, bias_rho, eps_w, eps_b
    )
    assert y.shape == (8, output_dim)
    assert jnp.allclose(y, y_ref, atol=1e-5, rtol=1e-5)
    assert jnp.allclose(logp, logp_ref, atol=1e-4, rtol=1e-5)

    print("KERNEL_OK")
</pallas_src>

<mosaic_0001>
module attributes {stable_mosaic.version = 11 : i64} {
  func.func @vi_model_kernel(%arg0: memref<8x32xf32, #tpu.memory_space<vmem>>, %arg1: memref<3x32x128xf32, #tpu.memory_space<vmem>>, %arg2: memref<3x1x128xf32, #tpu.memory_space<vmem>>, %arg3: memref<8x128xf32, #tpu.memory_space<vmem>>, %arg4: memref<1x1xf32, #tpu.memory_space<smem>>) attributes {dimension_semantics = [], scalar_prefetch = 0 : i64, scratch_operands = 0 : i64, tpu.core_type = #tpu.core_type<tc>} {
    %c1 = arith.constant 1 : index
    %c0 = arith.constant 0 : index
    %c0_0 = arith.constant 0 : index
    %0 = vector.load %arg1[%c1, %c0, %c0_0] : memref<3x32x128xf32, #tpu.memory_space<vmem>>, vector<1x32x128xf32>
    %1 = vector.shape_cast %0 : vector<1x32x128xf32> to vector<32x128xf32>
    %c2 = arith.constant 2 : index
    %c0_1 = arith.constant 0 : index
    %c0_2 = arith.constant 0 : index
    %2 = vector.load %arg1[%c2, %c0_1, %c0_2] : memref<3x32x128xf32, #tpu.memory_space<vmem>>, vector<1x32x128xf32>
    %3 = vector.shape_cast %2 : vector<1x32x128xf32> to vector<32x128xf32>
    %c1_3 = arith.constant 1 : index
    %c0_4 = arith.constant 0 : index
    %c0_5 = arith.constant 0 : index
    %4 = vector.load %arg2[%c1_3, %c0_4, %c0_5] : memref<3x1x128xf32, #tpu.memory_space<vmem>>, vector<1x1x128xf32>
    %5 = vector.shape_cast %4 : vector<1x1x128xf32> to vector<1x128xf32>
    %c2_6 = arith.constant 2 : index
    %c0_7 = arith.constant 0 : index
    %c0_8 = arith.constant 0 : index
    %6 = vector.load %arg2[%c2_6, %c0_7, %c0_8] : memref<3x1x128xf32, #tpu.memory_space<vmem>>, vector<1x1x128xf32>
    %7 = vector.shape_cast %6 : vector<1x1x128xf32> to vector<1x128xf32>
    %cst = arith.constant 0.000000e+00 : f32
    %8 = vector.broadcast %cst : f32 to vector<32x128xf32>
    %9 = arith.maximumf %1, %8 : vector<32x128xf32>
    %10 = vector.broadcast %cst : f32 to vector<32x128xf32>
    %11 = arith.subf %1, %10 : vector<32x128xf32>
    %12 = arith.cmpf one, %11, %11 : vector<32x128xf32>
    %13 = vector.broadcast %cst : f32 to vector<32x128xf32>
    %14 = arith.addf %1, %13 : vector<32x128xf32>
    %15 = math.absf %11 : vector<32x128xf32>
    %cst_9 = arith.constant 0.000000e+00 : f32
    %16 = vector.broadcast %cst_9 : f32 to vector<32x128xf32>
    %17 = arith.subf %16, %15 : vector<32x128xf32>
    %18 = math.exp %17 : vector<32x128xf32>
    %19 = math.log1p %18 : vector<32x128xf32>
    %20 = arith.addf %9, %19 : vector<32x128xf32>
    %21 = arith.select %12, %14, %20 : vector<32x128xi1>, vector<32x128xf32>
    %cst_10 = arith.constant 0.000000e+00 : f32
    %22 = vector.broadcast %cst_10 : f32 to vector<1x128xf32>
    %23 = arith.maximumf %5, %22 : vector<1x128xf32>
    %24 = vector.broadcast %cst_10 : f32 to vector<1x128xf32>
    %25 = arith.subf %5, %24 : vector<1x128xf32>
    %26 = arith.cmpf one, %25, %25 : vector<1x128xf32>
    %27 = vector.broadcast %cst_10 : f32 to vector<1x128xf32>
    %28 = arith.addf %5, %27 : vector<1x128xf32>
    %29 = math.absf %25 : vector<1x128xf32>
    %cst_11 = arith.constant 0.000000e+00 : f32
    %30 = vector.broadcast %cst_11 : f32 to vector<1x128xf32>
    %31 = arith.subf %30, %29 : vector<1x128xf32>
    %32 = math.exp %31 : vector<1x128xf32>
    %33 = math.log1p %32 : vector<1x128xf32>
    %34 = arith.addf %23, %33 : vector<1x128xf32>
    %35 = arith.select %26, %28, %34 : vector<1x128xi1>, vector<1x128xf32>
    %36 = math.log %21 : vector<32x128xf32>
    %cst_12 = arith.constant -0.918938517 : f32
    %37 = vector.broadcast %cst_12 : f32 to vector<32x128xf32>
    %38 = arith.subf %37, %36 : vector<32x128xf32>
    %cst_13 = arith.constant 5.000000e-01 : f32
    %39 = vector.broadcast %cst_13 : f32 to vector<32x128xf32>
    %40 = arith.mulf %39, %3 : vector<32x128xf32>
    %41 = arith.mulf %40, %3 : vector<32x128xf32>
    %42 = arith.subf %38, %41 : vector<32x128xf32>
    %43 = math.log %35 : vector<1x128xf32>
    %cst_14 = arith.constant -0.918938517 : f32
    %44 = vector.broadcast %cst_14 : f32 to vector<1x128xf32>
    %45 = arith.subf %44, %43 : vector<1x128xf32>
    %cst_15 = arith.constant 5.000000e-01 : f32
    %46 = vector.broadcast %cst_15 : f32 to vector<1x128xf32>
    %47 = arith.mulf %46, %7 : vector<1x128xf32>
    %48 = arith.mulf %47, %7 : vector<1x128xf32>
    %49 = arith.subf %45, %48 : vector<1x128xf32>
    %50 = tpu.iota {dimensions = array<i32: 1>} : vector<1x128xi32>
    %c16_i32 = arith.constant 16 : i32
    %51 = vector.broadcast %c16_i32 : i32 to vector<1x128xi32>
    %52 = arith.cmpi slt, %50, %51 : vector<1x128xi32>
    %cst_16 = arith.constant 0.000000e+00 : f32
    %53 = vector.broadcast %cst_16 : f32 to vector<1x128xf32>
    %54 = arith.select %52, %49, %53 : vector<1x128xi1>, vector<1x128xf32>
    %cst_17 = arith.constant 0.000000e+00 : f32
    %55 = vector.shape_cast %52 : vector<1x128xi1> to vector<1x128xi1>
    %56 = vector.broadcast %55 : vector<1x128xi1> to vector<32x128xi1>
    %57 = vector.broadcast %cst_17 : f32 to vector<32x128xf32>
    %58 = arith.select %56, %42, %57 : vector<32x128xi1>, vector<32x128xf32>
    %cst_18 = arith.constant dense<0.000000e+00> : vector<32xf32>
    %59 = vector.multi_reduction <add>, %58, %cst_18 [1] : vector<32x128xf32> to vector<32xf32>
    %60 = vector.shape_cast %59 : vector<32xf32> to vector<32x1xf32>
    %61 = vector.shape_cast %60 : vector<32x1xf32> to vector<1x32x1xf32>
    %cst_19 = arith.constant dense<0.000000e+00> : vector<1xf32>
    %62 = vector.multi_reduction <add>, %61, %cst_19 [1, 2] : vector<1x32x1xf32> to vector<1xf32>
    %63 = vector.shape_cast %62 : vector<1xf32> to vector<1x1x1xf32>
    %64 = vector.extract %63[0, 0, 0] : f32 from vector<1x1x1xf32>
    %65 = vector.shape_cast %54 : vector<1x128xf32> to vector<1x1x128xf32>
    %cst_20 = arith.constant dense<0.000000e+00> : vector<1xf32>
    %66 = vector.multi_reduction <add>, %65, %cst_20 [1, 2] : vector<1x1x128xf32> to vector<1xf32>
    %67 = vector.shape_cast %66 : vector<1xf32> to vector<1x1x1xf32>
    %68 = vector.extract %67[0, 0, 0] : f32 from vector<1x1x1xf32>
    %69 = arith.addf %64, %68 : f32
    %c0_21 = arith.constant 0 : index
    %c0_22 = arith.constant 0 : index
    %70 = memref.load %arg4[%c0_21, %c0_22] : memref<1x1xf32, #tpu.memory_space<smem>>
    memref.store %69, %arg4[%c0_21, %c0_22] : memref<1x1xf32, #tpu.memory_space<smem>>
    %c0_23 = arith.constant 0 : index
    %c0_24 = arith.constant 0 : index
    %c0_25 = arith.constant 0 : index
    %71 = vector.load %arg1[%c0_23, %c0_24, %c0_25] : memref<3x32x128xf32, #tpu.memory_space<vmem>>, vector<1x32x128xf32>
    %72 = vector.shape_cast %71 : vector<1x32x128xf32> to vector<32x128xf32>
    %73 = arith.mulf %21, %3 : vector<32x128xf32>
    %74 = arith.addf %72, %73 : vector<32x128xf32>
    %c0_26 = arith.constant 0 : index
    %c0_27 = arith.constant 0 : index
    %c0_28 = arith.constant 0 : index
    %75 = vector.load %arg2[%c0_26, %c0_27, %c0_28] : memref<3x1x128xf32, #tpu.memory_space<vmem>>, vector<1x1x128xf32>
    %76 = vector.shape_cast %75 : vector<1x1x128xf32> to vector<1x128xf32>
    %77 = arith.mulf %35, %7 : vector<1x128xf32>
    %78 = arith.addf %76, %77 : vector<1x128xf32>
    %c0_29 = arith.constant 0 : index
    %c0_30 = arith.constant 0 : index
    %79 = vector.load %arg0[%c0_29, %c0_30] : memref<8x32xf32, #tpu.memory_space<vmem>>, vector<8x32xf32>
    %cst_31 = arith.constant dense<0.000000e+00> : vector<8x128xf32>
    %80 = tpu.matmul %79, %74, %cst_31 {dimension_numbers = #tpu.dot_dimension_numbers<[1], [0], [0], [1], [0, 0, 1, 1], [], []>} : vector<8x32xf32>, vector<32x128xf32>, vector<8x128xf32> -> vector<8x128xf32>
    %81 = vector.broadcast %78 : vector<1x128xf32> to vector<8x128xf32>
    %82 = arith.addf %80, %81 : vector<8x128xf32>
    %83 = arith.negf %82 : vector<8x128xf32>
    %84 = math.exp %83 : vector<8x128xf32>
    %cst_32 = arith.constant 1.000000e+00 : f32
    %85 = vector.broadcast %cst_32 : f32 to vector<8x128xf32>
    %86 = arith.addf %85, %84 : vector<8x128xf32>
    %87 = arith.divf %85, %86 : vector<8x128xf32>
    %c0_33 = arith.constant 0 : index
    %c0_34 = arith.constant 0 : index
    %88 = vector.load %arg3[%c0_33, %c0_34] : memref<8x128xf32, #tpu.memory_space<vmem>>, vector<8x128xf32>
    tpu.vector_store %arg3[%c0_33, %c0_34], %87 {strides = array<i32>} : memref<8x128xf32, #tpu.memory_space<vmem>>, vector<8x128xf32>,
    return
  }
}

</mosaic_0001>

<bundles_post_ra>
// kernel: tpu_custom_call.1
= control target key start
LH: loop header
LB: loop body
LE: loop exit
PB: predicated region body
PF: predicated region fallthrough
CT: control target
= control target key end

     0   :  { %10 = vsyncpa [#allocation3], 0  ;;  %s632_s0 = inlined_call_operand.hbm [shape: f32[8,32], index: 0, kind: input, shape index: {}]   ;;  %s633_s1 = inlined_call_operand.hbm [shape: f32[3,32,128], index: 1, kind: input, shape index: {}]   ;;  %s634_s2 = inlined_call_operand.vmem [shape: f32[3,1,128], index: 2, kind: input, shape index: {}]   ;;  %s635_s3 = inlined_call_operand.hbm [shape: f32[8,128], index: 3, kind: output, shape index: {0}]   ;;  %s636_s4 = inlined_call_operand.hbm [shape: f32[1,1], index: 4, kind: output, shape index: {1}]  }
   0x1   :  { %11 = vsyncpa [#allocation7], 0 }
   0x2   :  { %12 = vsyncpa [#allocation4], 0 }
   0x3   :  { %13 = vsyncpa [#allocation5], 0  ;;  %s501_s15 = smov [#allocation2]   ;;  %s502_s17 = smov [#allocation6]  }
   0x4   :  { %s20_s16 = sshll.u32 %s501_s15, 4  ;;  %s29_s18 = sshll.u32 %s502_s17, 4  ;;  %s21_s16 = int_to_ptr.vmem [resolvable:$true] %s20_s16  ;;  %s30_s18 = int_to_ptr.vmem [resolvable:$true] %s29_s18 }
   0x5   :  { %s433_s19 = scalar_lea.vmem %s21_s16, 128  ;;  %p438_p1 = scmp.lt.s32.totalorder %s21_s16, %s21_s16 }
   0x6   :  { %p434_p0 = scmp.ne.s32.totalorder %s21_s16, %s433_s19  ;;  %p439_p2 = scmp.lt.s32.totalorder %s433_s19, %s433_s19 }
   0x8   :  { %p440_p3 = por %p439_p2, %p438_p1 }
   0xa   :  { %p441_p4 = pnand %p440_p3, %p434_p0 }
   0xc   :  { %444 = shalt.err (!%p441_p4)
}
   0xd   :  { %23 = dma.hbm_to_vmem [thread:$0]  %s632_s0, 128, %s21_s16, [#allocation3]  }
   0xe   :  { %s453_s22 = scalar_lea.vmem %s30_s18, 1536  ;;  %p458_p6 = scmp.lt.s32.totalorder %s30_s18, %s30_s18 }
   0xf   :  { %p454_p5 = scmp.ne.s32.totalorder %s30_s18, %s453_s22  ;;  %p459_p7 = scmp.lt.s32.totalorder %s453_s22, %s453_s22 }
  0x11   :  { %p460_p8 = por %p459_p7, %p458_p6 }
  0x13   :  { %p461_p9 = pnand %p460_p8, %p454_p5 }
  0x15   :  { %464 = shalt.err (!%p461_p9)
}
  0x16   :  { %s503_s23 = smov 128   ;;  %s504_s24 = smov 8  }
  0x17   :  { %35 = dma.hbm_to_vmem [thread:$0]  %s633_s1, 1536, %s30_s18, [#allocation7], %s503_s23, %s503_s23, %s504_s24  }
  0x18   :  { %493 = dma.done.wait [#allocation3], 128  }
  0x19   :  { %494 = vsyncadd [#allocation3], 4294967168 }
  0x1a   :  { %495 = dma.done.wait [#allocation7], 1536  }
  0x1b   :  { %496 = vsyncadd [#allocation7], 4294965760  ;;  %v505_v0 = vmov 0.0   ;;  %vm506_vm0 = vmmov 0   ;;  %v542_v1 = vld [vmem:[#allocation6 + $0x20] sm:$0xff]  ;;  %v544_v2 = vld [vmem:[#allocation6 + $0x30] sm:$0xff] }
  0x1c   :  { %368 = vmatprep.subr.mxu0 %v505_v0  ;;  %376 = vmatprep.mubr.msk.f32.mxu0 %vm506_vm0, %v505_v0  ;;  %v70_v3 = vand.u32 2147483647, %v542_v1  ;;  %v547_v4 = vld [vmem:[#allocation6 + $0x28] sm:$0xff]  ;;  %v72_v5 = vand.u32 2147483647, %v544_v2  ;;  %v550_v6 = vld [vmem:[#allocation6 + $0x38] sm:$0xff]  ;;  %vm62_vm1 = vcmp.ne.f32.partialorder %v542_v1, %v542_v1  ;;  %vm64_vm4 = vcmp.ne.f32.partialorder %v544_v2, %v544_v2 }
  0x1d   :  { %v71_v9 = vand.u32 2147483647, %v547_v4  ;;  %v73_v11 = vand.u32 2147483647, %v550_v6  ;;  %v557_v17 = vld [vmem:[%s634_s2 + $0x1] sm:$0x1]  ;;  %vm63_vm7 = vcmp.ne.f32.partialorder %v547_v4, %v547_v4  ;;  %vm65_vm8 = vcmp.ne.f32.partialorder %v550_v6, %v550_v6 }
  0x1e   :  { %v74_v7 = vsub.f32 0.0, %v70_v3  ;;  %v76_v8 = vsub.f32 0.0, %v72_v5  ;;  %v133_v18 = vand.u32 2147483647, %v557_v17  ;;  %v58_v38 = vmax.f32 %v542_v1, 0.0  ;;  %s507_s5 = smov [#allocation8]  }
  0x1f   :  { %v75_v13 = vsub.f32 0.0, %v71_v9  ;;  %v77_v14 = vsub.f32 0.0, %v73_v11  ;;  %v60_v50 = vmax.f32 %v544_v2, 0.0  ;;  %v59_v53 = vmax.f32 %v547_v4, 0.0  ;;  %s336_s6 = sshll.u32 %s507_s5, 4  ;;  %s337_s6 = int_to_ptr.vmem [resolvable:$true] %s336_s6 }
  0x20   :  { %v78_v10 = vmul.f32 1.442695, %v74_v7  ;;  %v82_v12 = vmul.f32 1.442695, %v76_v8  ;;  %v134_v19 = vsub.f32 0.0, %v133_v18  ;;  %v61_v58 = vmax.f32 %v550_v6, 0.0  ;;  %p470_p11 = scmp.lt.s32.totalorder %s337_s6, %s337_s6 }
  0x21   :  { %v80_v15 = vmul.f32 1.442695, %v75_v13  ;;  %v84_v16 = vmul.f32 1.442695, %v77_v14  ;;  %v51_v13 = vld [vmem:[#allocation6 + $0x48] sm:$0xff]  ;;  %vm249_vm10 = vcmask 261120   ;;  %vm131_vm11 = vcmp.ne.f32.partialorder %v557_v17, %v557_v17 }
  0x22   :  { %391 = vpow2.f32 %v78_v10  ;;  %v135_v20 = vmul.f32 1.442695, %v134_v19  ;;  %v230_v19 = vld [vmem:[#allocation6 + $0x18] sm:$0xff]  ;;  %vm213_vm13 = vcmask 1040384   ;;  %vm196_vm14 = vcmask 7168   ;;  %s465_s7 = scalar_lea.vmem %s337_s6, 128 }
  0x23   :  { %393 = vpow2.f32 %v82_v12  ;;  %v52_v12 = vld [vmem:[#allocation6 + $0x50] sm:$0xff]  ;;  %p466_p10 = scmp.ne.s32.totalorder %s337_s6, %s465_s7  ;;  %p471_p12 = scmp.lt.s32.totalorder %s465_s7, %s465_s7 }
  0x24   :  { %395 = vpow2.f32 %v80_v15 }
  0x25   :  { %397 = vpow2.f32 %v84_v16  ;;  %v53_v16 = vld [vmem:[#allocation6 + $0x58] sm:$0xff]  ;;  %p472_p13 = por %p471_p12, %p470_p11 }
  0x26   :  { %399 = vpow2.f32 %v135_v20  ;;  %v229_v20 = vld [vmem:[#allocation6 + $0x10] sm:$0xff] }
  0x27   :  { %p473_p0 = pnand %p472_p13, %p466_p10 }
  0x2f   :  { %v392_v21 = vpop.eup %391 }
  0x30   :  { %v394_v22 = vpop.eup %393  ;;  %v86_v23 = vadd.f32 1.0, %v392_v21  ;;  %v89_v29 = vmul.f32 -0.5, %v392_v21  ;;  %v92_v34 = vand.u32 2147483647, %v392_v21 }
  0x31   :  { %v104_v24 = vadd.f32 1.0, %v394_v22  ;;  %v396_v25 = vpop.eup %395  ;;  %v107_v30 = vmul.f32 -0.5, %v394_v22  ;;  %v110_v36 = vand.u32 2147483647, %v394_v22 }
  0x32   :  { %401 = vlog2.f32 %v86_v23  ;;  %v398_v26 = vpop.eup %397  ;;  %v95_v27 = vadd.f32 1.0, %v396_v25  ;;  %v98_v31 = vmul.f32 -0.5, %v396_v25  ;;  %v90_v32 = vadd.f32 1.0, %v89_v29  ;;  %v50_v23 = vld [vmem:[#allocation6 + $0x40] sm:$0xff] }
  0x33   :  { %403 = vlog2.f32 %v104_v24  ;;  %v113_v28 = vadd.f32 1.0, %v398_v26  ;;  %v116_v33 = vmul.f32 -0.5, %v398_v26  ;;  %v108_v35 = vadd.f32 1.0, %v107_v30  ;;  %v560_v37 = vpop.eup %399  ;;  %v228_v24 = vld [vmem:[#allocation6 + $0x8] sm:$0xff] }
  0x34   :  { %405 = vlog2.f32 %v95_v27  ;;  %v99_v39 = vadd.f32 1.0, %v98_v31  ;;  %v91_v40 = vmul.f32 %v392_v21, %v90_v32  ;;  %v101_v41 = vand.u32 2147483647, %v396_v25 }
  0x35   :  { %407 = vlog2.f32 %v113_v28  ;;  %v117_v42 = vadd.f32 1.0, %v116_v33  ;;  %v137_v43 = vadd.f32 1.0, %v560_v37  ;;  %vm566_vm2 = vcmp.lt.f32.partialorder %v92_v34, 0.0004427343 }
  0x36   :  { %v109_v46 = vmul.f32 %v394_v22, %v108_v35  ;;  %v119_v47 = vand.u32 2147483647, %v398_v26  ;;  %vm571_vm3 = vcmp.lt.f32.partialorder %v110_v36, 0.0004427343  ;;  %v100_v54 = vmul.f32 %v396_v25, %v99_v39 }
  0x37   :  { %409 = vlog2.f32 %v137_v43  ;;  %vm580_vm5 = vcmp.lt.f32.partialorder %v101_v41, 0.0004427343  ;;  %v118_v59 = vmul.f32 %v398_v26, %v117_v42  ;;  %v143_v30 = vand.u32 2147483647, %v560_v37  ;;  %v242_v41 = vld [vmem:[#allocation2] sm:$0xff] }
  0x38   :  { %vm120_vm6 = vcmp.lt.f32.partialorder %v119_v47, 0.0004427343  ;;  %v178_v33 = vlaneseq  ;;  %v130_v34 = vmax.f32 %v557_v17, 0.0  ;;  %v160_v35 = vmul.f32 0.5, %v50_v23 }
  0x39   :  { %vm144_vm9 = vcmp.lt.f32.partialorder %v143_v30, 0.0004427343  ;;  %v162_v39 = vmul.f32 0.5, %v52_v12  ;;  %v161_v43 = vmul.f32 0.5, %v51_v13 }
  0x3a   :  { %v179_v42 = vand.u32 127, %v178_v33  ;;  %v164_v47 = vmul.f32 %v160_v35, %v50_v23 }
  0x3c   :  { %vm180_vm12 = vcmp.lt.s32.totalorder %v179_v42, 16 }
  0x3f   :  { %v402_v44 = vpop.eup %401 }
  0x40   :  { %v404_v48 = vpop.eup %403  ;;  %v88_v49 = vmul.f32 0.6931472, %v402_v44 }
  0x41   :  { %v106_v52 = vmul.f32 0.6931472, %v404_v48  ;;  %v406_v55 = vpop.eup %405  ;;  %v163_v48 = vmul.f32 0.5, %v53_v16 }
  0x42   :  { %v94_v56 = vsel %vm566_vm2, %v91_v40, %v88_v49  ;;  %v408_v60 = vpop.eup %407  ;;  %v97_v63 = vmul.f32 0.6931472, %v406_v55 }
  0x43   :  { %v122_v61 = vadd.f32 %v94_v56, %v58_v38  ;;  %v112_v62 = vsel %vm571_vm3, %v109_v46, %v106_v52  ;;  %v115_v5 = vmul.f32 0.6931472, %v408_v60  ;;  %v165_v56 = vmul.f32 %v161_v43, %v51_v13 }
  0x44   :  { %v124_v3 = vadd.f32 %v112_v62, %v60_v50  ;;  %v103_v8 = vsel %vm580_vm5, %v100_v54, %v97_v63  ;;  %v410_v29 = vpop.eup %409  ;;  %v166_v50 = vmul.f32 %v162_v39, %v52_v12 }
  0x45   :  { %v126_v7 = vsel %vm62_vm1, %v542_v1, %v122_v61  ;;  %v123_v10 = vadd.f32 %v103_v8, %v59_v53  ;;  %v121_v11 = vsel %vm120_vm6, %v118_v59, %v115_v5 }
  0x46   :  { %411 = vlog2.f32 %v126_v7  ;;  %v128_v9 = vsel %vm64_vm4, %v544_v2, %v124_v3  ;;  %v125_v1 = vadd.f32 %v121_v11, %v61_v58  ;;  %v140_v2 = vmul.f32 -0.5, %v560_v37 }
  0x47   :  { %413 = vlog2.f32 %v128_v9  ;;  %v127_v14 = vsel %vm63_vm7, %v547_v4, %v123_v10  ;;  %v233_v15 = vmul.f32 %v128_v9, %v52_v12  ;;  %v231_v27 = vmul.f32 %v126_v7, %v50_v23  ;;  %v227_v4 = vld [vmem:[#allocation6] sm:$0xff]  ;;  %v360_v9 = vld [vmem:[%s634_s2 + $0x2] sm:$0x1] }
  0x48   :  { %415 = vlog2.f32 %v127_v14  ;;  %v129_v18 = vsel %vm65_vm8, %v550_v6, %v125_v1  ;;  %v232_v22 = vmul.f32 %v127_v14, %v51_v13  ;;  %v141_v28 = vadd.f32 1.0, %v140_v2 }
  0x49   :  { %417 = vlog2.f32 %v129_v18  ;;  %v234_v21 = vmul.f32 %v129_v18, %v53_v16  ;;  %v237_v26 = vadd.f32 %v233_v15, %v229_v20  ;;  %v139_v6 = vmul.f32 0.6931472, %v410_v29  ;;  %v239_v29 = vld [vmem:[%s634_s2] sm:$0x1] }
  0x4a   :  { %v236_v31 = vadd.f32 %v232_v22, %v228_v24  ;;  %v142_v32 = vmul.f32 %v560_v37, %v141_v28  ;;  %v235_v36 = vadd.f32 %v231_v27, %v227_v4  ;;  %v167_v58 = vmul.f32 %v163_v48, %v53_v16 }
  0x4b   :  { %v238_v25 = vadd.f32 %v234_v21, %v230_v19  ;;  %v175_v11 = vmul.f32 0.5, %v360_v9  ;;  %v245_v28 = vshrl.u32 %v178_v33, 7 }
  0x4c   :  { %v145_v38 = vsel %vm144_vm9, %v142_v32, %v139_v6 }
  0x4d   :  { %369 = vmatpush3.msra.mxu0 %v238_v25  ;;  %v146_v40 = vadd.f32 %v145_v38, %v130_v34  ;;  %v176_v1 = vmul.f32 %v360_v9, %v175_v11  ;;  %v246_v30 = vsub.s32 0, %v245_v28 }
  0x4e   :  { %370 = vmatprep.subr.mxu0 %v505_v0 }
  0x4f   :  { %371 = vmatpush3.msra.mxu0 %v237_v26  ;;  %v147_v44 = vsel %vm131_vm11, %v557_v17, %v146_v40 }
  0x50   :  { %372 = vmatprep.subr.mxu0 %v505_v0  ;;  %419 = vlog2.f32 %v147_v44  ;;  %v240_v27 = vmul.f32 %v360_v9, %v147_v44 }
  0x51   :  { %373 = vmatpush3.msra.mxu0 %v236_v31 }
  0x52   :  { %374 = vmatprep.subr.mxu0 %v505_v0  ;;  %v241_v4 = vadd.f32 %v240_v27, %v239_v29 }
  0x53   :  { %v412_v37 = vpop.eup %411  ;;  %375 = vmatpush3.msra.mxu0 %v235_v36 }
  0x54   :  { %v414_v45 = vpop.eup %413  ;;  %v149_v46 = vmul.f32 0.6931472, %v412_v37  ;;  %377 = vmatmul.mubr.msk.f32.vlgmr.msra.gmra.mxu0 %vm249_vm10, %v242_v41  ;;  %v247_v31 = vrot.slane %v241_v4, %v246_v30 }
  0x55   :  { %v153_v49 = vmul.f32 0.6931472, %v414_v45  ;;  %v416_v51 = vpop.eup %415 }
  0x56   :  { %v156_v52 = vsub.f32 -0.9189385, %v149_v46  ;;  %v418_v53 = vpop.eup %417  ;;  %v151_v55 = vmul.f32 0.6931472, %v416_v51 }
  0x57   :  { %v158_v54 = vsub.f32 -0.9189385, %v153_v49  ;;  %v155_v0 = vmul.f32 0.6931472, %v418_v53 }
  0x58   :  { %v168_v57 = vsub.f32 %v156_v52, %v164_v47  ;;  %v157_v59 = vsub.f32 -0.9189385, %v151_v55 }
  0x59   :  { %v170_v17 = vsub.f32 %v158_v54, %v166_v50  ;;  %v159_v61 = vsub.f32 -0.9189385, %v155_v0 }
  0x5a   :  { %v184_v60 = vsel %vm180_vm12, %v168_v57, 0.0  ;;  %v169_v63 = vsub.f32 %v157_v59, %v165_v56 }
  0x5b   :  { %188 = vadd.xlane.f32.xlu0 %v184_v60  ;;  %v186_v62 = vsel %vm180_vm12, %v170_v17, 0.0  ;;  %v171_v3 = vsub.f32 %v159_v61, %v167_v58 }
  0x5c   :  { %192 = vadd.xlane.f32.xlu1 %v186_v62  ;;  %v185_v5 = vsel %vm180_vm12, %v169_v63, 0.0 }
  0x5d   :  { %v187_v7 = vsel %vm180_vm12, %v171_v3, 0.0  ;;  %v420_v8 = vpop.eup %419 }
  0x5e   :  { %v173_v10 = vmul.f32 0.6931472, %v420_v8 }
  0x5f   :  { %190 = vadd.xlane.f32.xlu0 %v185_v5 }
  0x60   :  { %194 = vadd.xlane.f32.xlu1 %v187_v7  ;;  %v174_v12 = vsub.f32 -0.9189385, %v173_v10 }
  0x62   :  { %v177_v13 = vsub.f32 %v174_v12, %v176_v1 }
  0x64   :  { %v181_v14 = vsel %vm180_vm12, %v177_v13, 0.0 }
  0x65   :  { %v214_v15 = vsel %vm213_vm13, %v181_v14, 0.0 }
  0x66   :  { %215 = vadd.xlane.f32.xlu1 %v214_v15 }
  0xe4   :  { %v189_v16 = vpop.xlane.xlu0 %188 }
  0xe5   :  { %v193_v18 = vpop.xlane.xlu1 %192  ;;  %v197_v20 = vsel %vm196_vm14, %v189_v16, 0.0 }
  0xe6   :  { %v200_v23 = vsel %vm196_vm14, %v193_v18, 0.0 }
  0xe8   :  { %v191_v19 = vpop.xlane.xlu0 %190 }
  0xe9   :  { %v198_v21 = vsel %vm196_vm14, %v191_v19, 0.0  ;;  %v195_v22 = vpop.xlane.xlu1 %194 }
  0xea   :  { %v199_v2 = vadd.f32 %v198_v21, %v197_v20  ;;  %v202_v24 = vsel %vm196_vm14, %v195_v22, 0.0 }
  0xec   :  { %v201_v25 = vadd.f32 %v200_v23, %v199_v2 }
  0xee   :  { %v203_v26 = vadd.f32 %v202_v24, %v201_v25 }
  0xf0   :  { %204 = vadd.xlane.f32.xlu0 %v203_v26 }
 0x114   :  { %v319_v6 = vpop.f32.mrf.mxu0 }
 0x115   :  { %v320_v32 = vadd.f32 %v319_v6, %v247_v31 }
 0x116   :  { %v378_v34 = vpop.f32.mrf.mxu0 }
 0x117   :  { %v362_v35 = vmul.f32 -1.442695, %v320_v32 }
 0x119   :  { %421 = vpow2.f32 %v362_v35 }
 0x126   :  { %v422_v36 = vpop.eup %421 }
 0x127   :  { %v326_v38 = vadd.f32 1.0, %v422_v36 }
 0x129   :  { %423 = vrcp.f32 %v326_v38 }
 0x136   :  { %v424_v39 = vpop.eup %423 }
 0x137   :  { %329 = vst [vmem:[#allocation8] sm:$0xff] %v424_v39 }
 0x138   :  { %476 = shalt.err (!%p473_p0)
}
 0x139   :  { %339 = dma.vmem_to_hbm [thread:$0]  %s337_s6, 128, %s635_s3, [#allocation4]   ;;  %v216_v33 = vpop.xlane.xlu1 %215 }
 0x13a   :  { %v217_v40 = vrot.slane %v216_v33, 4  ;;  %s508_s3 = smov [#allocation9]  }
 0x13c   :  { %v218_v41 = vadd.f32 %v217_v40, %v216_v33 }
 0x13e   :  { %v219_v37 = vrot.slane %v218_v41, 2 }
 0x140   :  { %v220_v45 = vadd.f32 %v219_v37, %v218_v41 }
 0x142   :  { %v221_v48 = vrot.slane %v220_v45, 1 }
 0x144   :  { %v222_v51 = vadd.f32 %v221_v48, %v220_v45 }
 0x179   :  { %v205_v42 = vpop.xlane.xlu0 %204 }
 0x17a   :  { %v206_v43 = vrot.slane %v205_v42, 4 }
 0x17c   :  { %v207_v44 = vadd.f32 %v206_v43, %v205_v42 }
 0x17e   :  { %v208_v46 = vrot.slane %v207_v44, 2 }
 0x180   :  { %v209_v47 = vadd.f32 %v208_v46, %v207_v44 }
 0x182   :  { %v210_v49 = vrot.slane %v209_v47, 1 }
 0x184   :  { %v211_v50 = vadd.f32 %v210_v49, %v209_v47 }
 0x186   :  { %379 = vpush %v211_v50 }
 0x187   :  { %381 = vpush %v222_v51 }
 0x1b7   :  { %s380_s9 = spop %379 }
 0x1b8   :  { %s382_s10 = spop %381 }
 0x1b9   :  { %s224_s11 = sadd.f32 %s382_s10, %s380_s9 }
 0x1bb   :  { %226 = sst [smem:[#allocation9]] %s224_s11 }
 0x1bc   :  { %347 = dma.smem_to_hbm %s508_s3, 16, %s636_s4, [#allocation5]  }
 0x1bd   :  { %497 = dma.done.wait [#allocation4], 128  }
 0x1be   :  { %498 = vsyncadd [#allocation4], 4294967168 }
 0x1bf   :  { %499 = dma.done.wait [#allocation5], 16  }
 0x1c0   :  { %500 = vsyncadd [#allocation5], 4294967280 }
 0x1c1   :  { %354 = sfence }
 0x1c2   :  { %355 = vsyncpa [#allocation3], 1 }
 0x1c3   :  { %356 = vsyncpa [#allocation7], 1 }
 0x1c4   :  { %357 = vsyncpa [#allocation4], 1 }
 0x1c5   :  { %358 = vsyncpa [#allocation5], 1 }

</bundles_post_ra>
